<compile_context>
chip_gen: v5e
topology: v5e:2x2
jax: 0.10.0
libtpu: 0.0.40
codegen_flags: <defaults>
</compile_context>

<pallas_src>
import jax
import jax.numpy as jnp
from jax.experimental import pallas as pl
from jax.experimental.pallas import tpu as pltpu


def _identity_kernel(x_ref, o_ref):
    # Pure VMEM tile copy (only used on the explicit force_pallas path).
    o_ref[...] = x_ref[...]


def _round_up(a, m):
    return ((a + m - 1) // m) * m


def identity_embedding(
    node_state,
    neighbors=None,
    *,
    force_pallas=False,
    target_lanes=1024,            # lane-dense last dim (multiple of 128) when it divides n
    target_block_bytes=6 << 20,   # ~6 MiB blocks: 2 arrays x 2 buffers = 24 MiB VMEM
    min_grid_blocks=2,            # keep both v7x TensorCores fed on mid/large inputs
):
    """Pallas implementation of IdentityEmbedding.forward: returns node_state.

    Default path: return the input (identity needs no kernel, no HBM traffic).
    force_pallas=True: run a bandwidth-optimal copy kernel into a fresh output
    buffer so the Pallas path can be exercised and validated.
    """
    if not force_pallas or node_state.size == 0:
        return node_state

    orig_shape = node_state.shape
    n = node_state.size
    itemsize = jnp.dtype(node_state.dtype).itemsize

    # ---- 2-D view with zero extra HBM traffic (row-major reshape only) ------
    if n % 128 == 0:
        # Lane-dense: largest multiple of 128 <= target_lanes that divides n.
        lanes = 128
        c = (min(target_lanes, n) // 128) * 128
        while c >= 128:
            if n % c == 0:
                lanes = c
                break
            c -= 128
        rows = n // lanes
    else:
        # Awkward size: keep the natural trailing dim as a full-extent last
        # block dim -> masked stores, but NO pad / slice round trips.
        lanes = orig_shape[-1] if node_state.ndim >= 1 else 1
        rows = n // lanes
    x2d = node_state.reshape(rows, lanes)

    # ---- block sizing --------------------------------------------------------
    rows_per_block = max(1, target_block_bytes // (lanes * itemsize))
    # Multiple of 32 rows keeps bf16 (16-row) / int8+fp8 (32-row) packing native.
    rows_per_block = max(32, (rows_per_block // 32) * 32)

    if rows <= rows_per_block:
        block_rows = rows  # full extent: always a legal block shape
        # Megacore: if large enough, split into >= min_grid_blocks multiple-of-8
        # row tiles so a single-block grid doesn't idle one v7x TensorCore.
        if rows >= 8 * min_grid_blocks:
            block_rows = _round_up(pl.cdiv(rows, min_grid_blocks), 8)
    else:
        block_rows = rows_per_block

    grid = (pl.cdiv(rows, block_rows),)

    out2d = pl.pallas_call(
        _identity_kernel,
        out_shape=jax.ShapeDtypeStruct((rows, lanes), x2d.dtype),
        grid_spec=pltpu.PrefetchScalarGridSpec(
            num_scalar_prefetch=0,
            grid=grid,
            in_specs=[pl.BlockSpec((block_rows, lanes), lambda i: (i, 0))],
            out_specs=pl.BlockSpec((block_rows, lanes), lambda i: (i, 0)),
        ),
        # No input_output_aliases: avoids a hidden defensive copy when the
        # caller's array is not donated; output is a fresh buffer.
        cost_estimate=pl.CostEstimate(
            flops=0, transcendentals=0, bytes_accessed=2 * n * itemsize),
        compiler_params=pltpu.CompilerParams(
            dimension_semantics=("parallel",),
            # Explicit limit so 6 MiB blocks (x2 arrays x2 buffers = 24 MiB)
            # also fit under v5e's 16 MiB *default* scoped VMEM.
            vmem_limit_bytes=32 << 20,
        ),
    )(x2d)

    return out2d.reshape(orig_shape)


if __name__ == "__main__":
    key = jax.random.PRNGKey(0)
    k1, k2 = jax.random.split(key)

    # Case 1: canonical [num_nodes, hidden] input, Pallas copy path exercised.
    num_nodes, hidden = 8, 32
    node_state = jax.random.normal(k1, (num_nodes, hidden), dtype=jnp.float32)
    out = jax.block_until_ready(identity_embedding(node_state, force_pallas=True))
    assert out.shape == node_state.shape and out.dtype == node_state.dtype
    assert bool(jnp.allclose(out, node_state)), "identity mismatch (case 1)"

    # Case 2: awkward shape (n % 128 != 0) -> natural-shape path, no pad/slice.
    x2 = jax.random.normal(k2, (2, 4, 37), dtype=jnp.float32)
    out2 = jax.block_until_ready(identity_embedding(x2, force_pallas=True))
    assert out2.shape == x2.shape and out2.dtype == x2.dtype
    assert bool(jnp.allclose(out2, x2)), "identity mismatch (case 2)"

    # Case 3: default path — identity returns its input directly (no kernel).
    out3 = jax.block_until_ready(identity_embedding(node_state))
    assert out3 is node_state, "default path should return the input unchanged"
    assert bool(jnp.allclose(out3, node_state)), "identity mismatch (case 3)"

    print("KERNEL_OK")
</pallas_src>

<mosaic_0001>
module attributes {stable_mosaic.version = 11 : i64} {
  func.func @_identity_kernel(%arg0: i32, %arg1: memref<1x256xf32, #tpu.memory_space<vmem>>, %arg2: memref<1x256xf32, #tpu.memory_space<vmem>>) attributes {dimension_semantics = [#tpu.dimension_semantics<parallel>], iteration_bounds = array<i64: 1>, scalar_prefetch = 0 : i64, scratch_operands = 0 : i64, tpu.core_type = #tpu.core_type<tc>, window_params = [{transform_indices = @transform_0, window_bounds = array<i64: 1, 256>}, {transform_indices = @transform_1, window_bounds = array<i64: 1, 256>}]} {
    %c0 = arith.constant 0 : index
    %c0_0 = arith.constant 0 : index
    %0 = vector.load %arg1[%c0, %c0_0] : memref<1x256xf32, #tpu.memory_space<vmem>>, vector<1x256xf32>
    %c0_1 = arith.constant 0 : index
    %c0_2 = arith.constant 0 : index
    %1 = vector.load %arg2[%c0_1, %c0_2] : memref<1x256xf32, #tpu.memory_space<vmem>>, vector<1x256xf32>
    tpu.vector_store %arg2[%c0_1, %c0_2], %0 {strides = array<i32>} : memref<1x256xf32, #tpu.memory_space<vmem>>, vector<1x256xf32>,
    return
  }
  func.func @transform_0(%arg0: i32) -> (i32, i32) {
    %c0_i32 = arith.constant 0 : i32
    %c0_i32_0 = arith.constant 0 : i32
    return %arg0, %c0_i32 : i32, i32
  }
  func.func @transform_1(%arg0: i32) -> (i32, i32) {
    %c0_i32 = arith.constant 0 : i32
    %c0_i32_0 = arith.constant 0 : i32
    return %arg0, %c0_i32 : i32, i32
  }
}

</mosaic_0001>

<bundles_post_ra>
// kernel: tpu_custom_call.1
= control target key start
LH: loop header
LB: loop body
LE: loop exit
PB: predicated region body
PF: predicated region fallthrough
CT: control target
= control target key end

     0   :  { %6 = vsyncpa [#allocation3], 0  ;;  %s118_s0 = inlined_call_operand.hbm [shape: f32[1,256], index: 0, kind: input, shape index: {}]   ;;  %s119_s1 = inlined_call_operand.hbm [shape: f32[1,256], index: 1, kind: output, shape index: {}]  }
   0x1   :  { %7 = vsyncpa [#allocation4], 0  ;;  %s13_s8 = sshll.u32 %s118_s0, 4  ;;  %s100_s9 = smov [#allocation2]   ;;  %s14_s8 = int_to_ptr.hbm [resolvable:$true] %s13_s8 }
   0x2   :  { %s15_s10 = sshll.u32 %s100_s9, 4  ;;  %s16_s10 = int_to_ptr.vmem [resolvable:$true] %s15_s10 }
   0x3   :  { %18 = dma.hbm_to_vmem [thread:$0]  %s14_s8, 32, %s16_s10, [#allocation3]  }
   0x4   :  { %96 = dma.done.wait [#allocation3], 32  }
   0x5   :  { %97 = vsyncadd [#allocation3], 4294967264  ;;  %v24_v0 = vlaneseq  ;;  %s101_s11 = smov [#allocation5]   ;;  %s36_s15 = sshll.u32 %s119_s1, 4  ;;  %v23_v1 = vld [vmem:[#allocation2] sm:$0x3]  ;;  %s37_s15 = int_to_ptr.hbm [resolvable:$true] %s36_s15 }
   0x6   :  { %s34_s12 = sshll.u32 %s101_s11, 4  ;;  %s35_s12 = int_to_ptr.vmem [resolvable:$true] %s34_s12 }
   0x7   :  { %vm26_vm0 = vcmp.lt.s32.totalorder %v24_v0, 256 }
   0x8   :  { %28 = vst.msk [vmem:[#allocation5] sm:$0x3] %vm26_vm0, %v23_v1 }
   0x9   :  { %39 = dma.vmem_to_hbm [thread:$0]  %s35_s12, 32, %s37_s15, [#allocation4]  }
   0xa   :  { %98 = dma.done.wait [#allocation4], 32  }
   0xb   :  { %99 = vsyncadd [#allocation4], 4294967264 }
   0xc   :  { %44 = vsyncpa [#allocation3], 1 }
   0xd   :  { %45 = vsyncpa [#allocation4], 1 }

</bundles_post_ra>
